<compile_context>
chip_gen: v7x
topology: tpu7x:2x2x1
jax: 0.10.0
libtpu: 0.0.40
codegen_flags: <defaults>
</compile_context>

<pallas_src>
import functools

import jax
import jax.numpy as jnp
from jax import lax
from jax.experimental import pallas as pl
from jax.experimental.pallas import tpu as pltpu


def _sconv1d_kernel(x_ref, w_ref, bias_ref, gamma_ref, beta_ref, o_ref, *,
                    ksize, pad, l_in, l_out, nb, num_groups, eps, w_lanes):
    """Fused Conv1d + GroupNorm + ReLU for a block of `nb` batch elements."""
    f32 = jnp.float32
    c_in = x_ref.shape[1]
    c_out = o_ref.shape[0]
    cpg = c_out // num_groups
    pad_lanes = w_lanes - nb * l_out

    # Per-tap slice geometry (static, shared by every batch element).
    tap_geom = []
    for k in range(ksize):
        off = k - pad
        lo = max(0, off)
        hi = min(l_in, l_out + off)
        left = lo - off                      # leading zero columns
        right = l_out - left - (hi - lo)     # trailing zero columns
        tap_geom.append((lo, hi, left, right))

    # Hoisted zero constants (jnp broadcasts are not CSE'd inside loops).
    zcache = {}
    def zeros(rows, width):
        key = (rows, width)
        if key not in zcache:
            zcache[key] = jnp.zeros((rows, width), f32)
        return zcache[key]

    # ---- im2col as a REGISTER value (no VMEM scratch round-trip). -----------
    # xcol[k*C_in + ci, b*L_out + j] = x_padded[b, ci, j + k]
    batch_cols = []
    for b in range(nb):                       # nb is small (lane cap), unrolled
        xb = x_ref[b]                         # (C_in, L) leading-dim read
        taps = []
        for k in range(ksize):
            lo, hi, left, right = tap_geom[k]
            parts = []
            if left > 0:
                parts.append(zeros(c_in, left))
            parts.append(xb[:, lo:hi])
            if right > 0:
                parts.append(zeros(c_in, right))
            taps.append(parts[0] if len(parts) == 1
                        else jnp.concatenate(parts, axis=1))
        batch_cols.append(jnp.concatenate(taps, axis=0))      # (K*C_in, L_out)
    xcol = (batch_cols[0] if nb == 1
            else jnp.concatenate(batch_cols, axis=1))          # (K*C_in, nb*L_out)
    if pad_lanes > 0:
        xcol = jnp.concatenate([xcol, zeros(ksize * c_in, pad_lanes)], axis=1)

    # ---- Conv1d: ONE MXU matmul over all taps and all batches in the block. -
    acc = jnp.dot(w_ref[...], xcol,
                  preferred_element_type=f32)                  # (C_out, W)

    # ---- GroupNorm: per-(group,batch) stats from SMALL sub-slabs; bias,
    # gamma, beta and 1/std folded into per-channel scale/shift columns. ------
    bias_col = bias_ref[...]                                   # (C_out, 1)
    gamma_col = gamma_ref[...]
    beta_col = beta_ref[...]
    bias_grp = [bias_col[g * cpg:(g + 1) * cpg, :] for g in range(num_groups)]
    inv_cnt = 1.0 / float(cpg * l_out)

    scale_segs = []
    shift_segs = []
    for b in range(nb):
        inv_rows = []
        mean_rows = []
        for g in range(num_groups):
            sub = acc[g * cpg:(g + 1) * cpg, b * l_out:(b + 1) * l_out]
            z = sub + bias_grp[g]                              # (cpg, L_out)
            s1 = jnp.sum(z, keepdims=True)                     # (1, 1)
            s2 = jnp.sum(z * z, keepdims=True)                 # (1, 1)
            mean = s1 * inv_cnt
            var = s2 * inv_cnt - mean * mean   # one-pass var; fine at eps=1e-5
            inv = lax.rsqrt(var + eps)
            inv_rows.append(jnp.broadcast_to(inv, (cpg, 1)))
            mean_rows.append(jnp.broadcast_to(mean, (cpg, 1)))
        inv_col = jnp.concatenate(inv_rows, axis=0)            # (C_out, 1)
        mean_col = jnp.concatenate(mean_rows, axis=0)          # (C_out, 1)
        scale_col = gamma_col * inv_col
        shift_col = (bias_col - mean_col) * scale_col + beta_col
        scale_segs.append(jnp.broadcast_to(scale_col, (c_out, l_out)))
        shift_segs.append(jnp.broadcast_to(shift_col, (c_out, l_out)))
    if pad_lanes > 0:
        scale_segs.append(zeros(c_out, pad_lanes))
        shift_segs.append(zeros(c_out, pad_lanes))
    scale = (scale_segs[0] if len(scale_segs) == 1
             else jnp.concatenate(scale_segs, axis=1))         # (C_out, W)
    shift = (shift_segs[0] if len(shift_segs) == 1
             else jnp.concatenate(shift_segs, axis=1))

    # ---- Single full-slab affine + ReLU, one lane-dense store. --------------
    o_ref[...] = jnp.maximum(acc * scale + shift, 0.0).astype(o_ref.dtype)


def sconv_1d(x, weight, bias, gamma, beta, *, pad, num_groups=2, eps=1e-5):
    """x: (N, C_in, L) f32; weight: (C_out, C_in, K); bias/gamma/beta: (C_out,)."""
    n, c_in, l = x.shape
    c_out, c_in_w, k = weight.shape
    assert c_in_w == c_in
    assert c_out % num_groups == 0
    l_out = l + 2 * pad - k + 1
    assert l_out > 0

    # nb selection: keep the live lane width per step modest (<= 512 lanes),
    # and keep >= 2 grid steps when n >= 2 so v7x's two TensorCores both get
    # work (negligible cost on single-TC v5e/v6e at these shapes).
    lane_cap = 512
    nb = 1
    for cand in range(1, n + 1):
        if n % cand != 0 or cand * l_out > lane_cap:
            continue
        if n >= 2 and n // cand < 2:
            continue
        nb = cand
    n_steps = n // nb
    w_lanes = ((nb * l_out + 127) // 128) * 128   # 128-aligned output block

    # Tiny one-time parameter re-layouts only; x is passed as-is (no HBM pad).
    # W2[co, k*C_in + ci] == weight[co, ci, k]  (matches the im2col row order).
    w2 = jnp.transpose(weight, (0, 2, 1)).reshape(c_out, k * c_in).astype(jnp.float32)
    b2 = bias.reshape(c_out, 1).astype(jnp.float32)
    g2 = gamma.reshape(c_out, 1).astype(jnp.float32)
    be2 = beta.reshape(c_out, 1).astype(jnp.float32)

    kern = functools.partial(_sconv1d_kernel, ksize=k, pad=pad, l_in=l,
                             l_out=l_out, nb=nb, num_groups=num_groups,
                             eps=eps, w_lanes=w_lanes)

    out_flat = pl.pallas_call(
        kern,
        out_shape=jax.ShapeDtypeStruct((c_out, n_steps * w_lanes), x.dtype),
        grid_spec=pltpu.PrefetchScalarGridSpec(
            num_scalar_prefetch=0,
            grid=(n_steps,),
            in_specs=[
                pl.BlockSpec((nb, c_in, l), lambda i: (i, 0, 0)),   # x batch-block
                pl.BlockSpec((c_out, k * c_in), lambda i: (0, 0)),  # fused weight
                pl.BlockSpec((c_out, 1), lambda i: (0, 0)),         # bias
                pl.BlockSpec((c_out, 1), lambda i: (0, 0)),         # gamma
                pl.BlockSpec((c_out, 1), lambda i: (0, 0)),         # beta
            ],
            out_specs=pl.BlockSpec((c_out, w_lanes), lambda i: (0, i)),
        ),
        compiler_params=pltpu.CompilerParams(
            dimension_semantics=("parallel",)),
    )(x, w2, b2, g2, be2)

    # (C_out, n_steps*W) -> (N, C_out, L_out): drop the 128-alignment junk
    # lanes per step and restore PyTorch's NCL layout (cheap XLA slice+transpose).
    out = out_flat.reshape(c_out, n_steps, w_lanes)[:, :, :nb * l_out]
    out = out.reshape(c_out, n, l_out)
    return jnp.transpose(out, (1, 0, 2))


def _reference(x, weight, bias, gamma, beta, *, pad, num_groups=2, eps=1e-5):
    """Plain-JAX reference matching PyTorch Conv1d + GroupNorm + ReLU."""
    y = lax.conv_general_dilated(
        x, weight, window_strides=(1,), padding=[(pad, pad)],
        dimension_numbers=("NCH", "OIH", "NCH"))
    y = y + bias[None, :, None]
    n, c, l = y.shape
    g = y.reshape(n, num_groups, c // num_groups, l)
    mean = jnp.mean(g, axis=(2, 3), keepdims=True)
    var = jnp.mean((g - mean) ** 2, axis=(2, 3), keepdims=True)
    g = (g - mean) * lax.rsqrt(var + eps)
    y = g.reshape(n, c, l) * gamma[None, :, None] + beta[None, :, None]
    return jnp.maximum(y, 0.0)


if __name__ == "__main__":
    # SConv_1D(in_ch=4, out_ch=8, kernel=3, pad=1)
    N, C_IN, C_OUT, L, K, PAD = 2, 4, 8, 16, 3, 1

    key = jax.random.PRNGKey(0)
    kx, kw, kb = jax.random.split(key, 3)

    x = jax.random.normal(kx, (N, C_IN, L), dtype=jnp.float32)
    # Deterministic parameter init (shapes per nn.Conv1d / nn.GroupNorm __init__).
    bound = 1.0 / (C_IN * K) ** 0.5
    weight = jax.random.uniform(kw, (C_OUT, C_IN, K), minval=-bound, maxval=bound,
                                dtype=jnp.float32)
    bias = jax.random.uniform(kb, (C_OUT,), minval=-bound, maxval=bound,
                              dtype=jnp.float32)
    gamma = jnp.ones((C_OUT,), dtype=jnp.float32)   # GroupNorm default affine init
    beta = jnp.zeros((C_OUT,), dtype=jnp.float32)

    out = sconv_1d(x, weight, bias, gamma, beta, pad=PAD)
    out = jax.block_until_ready(out)

    ref = _reference(x, weight, bias, gamma, beta, pad=PAD)
    assert out.shape == (N, C_OUT, L + 2 * PAD - K + 1)
    assert jnp.allclose(out, ref, atol=1e-4, rtol=1e-4)

    print("KERNEL_OK")
</pallas_src>

<mosaic_0001>
module attributes {stable_mosaic.version = 11 : i64} {
  func.func @_sconv1d_kernel(%arg0: i32, %arg1: memref<1x4x16xf32, #tpu.memory_space<vmem>>, %arg2: memref<8x12xf32, #tpu.memory_space<vmem>>, %arg3: memref<8x1xf32, #tpu.memory_space<vmem>>, %arg4: memref<8x1xf32, #tpu.memory_space<vmem>>, %arg5: memref<8x1xf32, #tpu.memory_space<vmem>>, %arg6: memref<8x128xf32, #tpu.memory_space<vmem>>) attributes {dimension_semantics = [#tpu.dimension_semantics<parallel>], iteration_bounds = array<i64: 2>, scalar_prefetch = 0 : i64, scratch_operands = 0 : i64, tpu.core_type = #tpu.core_type<tc>, window_params = [{transform_indices = @transform_0, window_bounds = array<i64: 1, 4, 16>}, {pipeline_mode = #tpu.pipeline_mode<synchronous>, transform_indices = @transform_1, window_bounds = array<i64: 8, 12>}, {pipeline_mode = #tpu.pipeline_mode<synchronous>, transform_indices = @transform_2, window_bounds = array<i64: 8, 1>}, {pipeline_mode = #tpu.pipeline_mode<synchronous>, transform_indices = @transform_3, window_bounds = array<i64: 8, 1>}, {pipeline_mode = #tpu.pipeline_mode<synchronous>, transform_indices = @transform_4, window_bounds = array<i64: 8, 1>}, {transform_indices = @transform_5, window_bounds = array<i64: 8, 128>}]} {
    %c0 = arith.constant 0 : index
    %c0_0 = arith.constant 0 : index
    %c0_1 = arith.constant 0 : index
    %0 = vector.load %arg1[%c0, %c0_0, %c0_1] : memref<1x4x16xf32, #tpu.memory_space<vmem>>, vector<1x4x16xf32>
    %1 = vector.shape_cast %0 : vector<1x4x16xf32> to vector<4x16xf32>
    %cst = arith.constant 0.000000e+00 : f32
    %2 = vector.broadcast %cst : f32 to vector<4x1xf32>
    %3 = vector.extract_strided_slice %1 {offsets = [0, 0], sizes = [4, 15], strides = [1, 1]} : vector<4x16xf32> to vector<4x15xf32>
    %4 = tpu.concatenate %2, %3 in 1 : vector<4x1xf32>, vector<4x15xf32> -> vector<4x16xf32>
    %5 = vector.extract_strided_slice %1 {offsets = [0, 1], sizes = [4, 15], strides = [1, 1]} : vector<4x16xf32> to vector<4x15xf32>
    %6 = tpu.concatenate %5, %2 in 1 : vector<4x15xf32>, vector<4x1xf32> -> vector<4x16xf32>
    %7 = tpu.concatenate %4, %1, %6 in 0 : vector<4x16xf32>, vector<4x16xf32>, vector<4x16xf32> -> vector<12x16xf32>
    %cst_2 = arith.constant 0.000000e+00 : f32
    %8 = vector.broadcast %cst_2 : f32 to vector<12x112xf32>
    %9 = tpu.concatenate %7, %8 in 1 : vector<12x16xf32>, vector<12x112xf32> -> vector<12x128xf32>
    %c0_3 = arith.constant 0 : index
    %c0_4 = arith.constant 0 : index
    %10 = vector.load %arg2[%c0_3, %c0_4] : memref<8x12xf32, #tpu.memory_space<vmem>>, vector<8x12xf32>
    %cst_5 = arith.constant dense<0.000000e+00> : vector<8x128xf32>
    %11 = tpu.matmul %10, %9, %cst_5 {dimension_numbers = #tpu.dot_dimension_numbers<[1], [0], [0], [1], [0, 0, 1, 1], [], []>} : vector<8x12xf32>, vector<12x128xf32>, vector<8x128xf32> -> vector<8x128xf32>
    %c0_6 = arith.constant 0 : index
    %c0_7 = arith.constant 0 : index
    %12 = vector.load %arg3[%c0_6, %c0_7] : memref<8x1xf32, #tpu.memory_space<vmem>>, vector<8x1xf32>
    %c0_8 = arith.constant 0 : index
    %c0_9 = arith.constant 0 : index
    %13 = vector.load %arg4[%c0_8, %c0_9] : memref<8x1xf32, #tpu.memory_space<vmem>>, vector<8x1xf32>
    %c0_10 = arith.constant 0 : index
    %c0_11 = arith.constant 0 : index
    %14 = vector.load %arg5[%c0_10, %c0_11] : memref<8x1xf32, #tpu.memory_space<vmem>>, vector<8x1xf32>
    %15 = vector.extract_strided_slice %12 {offsets = [0, 0], sizes = [4, 1], strides = [1, 1]} : vector<8x1xf32> to vector<4x1xf32>
    %16 = vector.extract_strided_slice %12 {offsets = [4, 0], sizes = [4, 1], strides = [1, 1]} : vector<8x1xf32> to vector<4x1xf32>
    %17 = vector.extract_strided_slice %11 {offsets = [0, 0], sizes = [4, 16], strides = [1, 1]} : vector<8x128xf32> to vector<4x16xf32>
    %18 = vector.broadcast %15 : vector<4x1xf32> to vector<4x16xf32>
    %19 = arith.addf %17, %18 : vector<4x16xf32>
    %20 = vector.shape_cast %19 : vector<4x16xf32> to vector<1x4x16xf32>
    %cst_12 = arith.constant dense<0.000000e+00> : vector<1xf32>
    %21 = vector.multi_reduction <add>, %20, %cst_12 [1, 2] : vector<1x4x16xf32> to vector<1xf32>
    %22 = vector.shape_cast %21 : vector<1xf32> to vector<1x1x1xf32>
    %23 = vector.extract %22[0, 0, 0] : f32 from vector<1x1x1xf32>
    %24 = vector.broadcast %23 : f32 to vector<1x1xf32>
    %25 = arith.mulf %19, %19 : vector<4x16xf32>
    %26 = vector.shape_cast %25 : vector<4x16xf32> to vector<1x4x16xf32>
    %cst_13 = arith.constant dense<0.000000e+00> : vector<1xf32>
    %27 = vector.multi_reduction <add>, %26, %cst_13 [1, 2] : vector<1x4x16xf32> to vector<1xf32>
    %28 = vector.shape_cast %27 : vector<1xf32> to vector<1x1x1xf32>
    %29 = vector.extract %28[0, 0, 0] : f32 from vector<1x1x1xf32>
    %30 = vector.broadcast %29 : f32 to vector<1x1xf32>
    %cst_14 = arith.constant 1.562500e-02 : f32
    %31 = vector.broadcast %cst_14 : f32 to vector<1x1xf32>
    %32 = arith.mulf %24, %31 : vector<1x1xf32>
    %cst_15 = arith.constant 1.562500e-02 : f32
    %33 = vector.broadcast %cst_15 : f32 to vector<1x1xf32>
    %34 = arith.mulf %30, %33 : vector<1x1xf32>
    %35 = arith.mulf %32, %32 : vector<1x1xf32>
    %36 = arith.subf %34, %35 : vector<1x1xf32>
    %cst_16 = arith.constant 9.99999974E-6 : f32
    %37 = vector.broadcast %cst_16 : f32 to vector<1x1xf32>
    %38 = arith.addf %36, %37 : vector<1x1xf32>
    %39 = math.rsqrt %38 : vector<1x1xf32>
    %40 = vector.shape_cast %39 : vector<1x1xf32> to vector<1x1xf32>
    %41 = vector.broadcast %40 : vector<1x1xf32> to vector<4x1xf32>
    %42 = vector.shape_cast %32 : vector<1x1xf32> to vector<1x1xf32>
    %43 = vector.broadcast %42 : vector<1x1xf32> to vector<4x1xf32>
    %44 = vector.extract_strided_slice %11 {offsets = [4, 0], sizes = [4, 16], strides = [1, 1]} : vector<8x128xf32> to vector<4x16xf32>
    %45 = vector.broadcast %16 : vector<4x1xf32> to vector<4x16xf32>
    %46 = arith.addf %44, %45 : vector<4x16xf32>
    %47 = vector.shape_cast %46 : vector<4x16xf32> to vector<1x4x16xf32>
    %cst_17 = arith.constant dense<0.000000e+00> : vector<1xf32>
    %48 = vector.multi_reduction <add>, %47, %cst_17 [1, 2] : vector<1x4x16xf32> to vector<1xf32>
    %49 = vector.shape_cast %48 : vector<1xf32> to vector<1x1x1xf32>
    %50 = vector.extract %49[0, 0, 0] : f32 from vector<1x1x1xf32>
    %51 = vector.broadcast %50 : f32 to vector<1x1xf32>
    %52 = arith.mulf %46, %46 : vector<4x16xf32>
    %53 = vector.shape_cast %52 : vector<4x16xf32> to vector<1x4x16xf32>
    %cst_18 = arith.constant dense<0.000000e+00> : vector<1xf32>
    %54 = vector.multi_reduction <add>, %53, %cst_18 [1, 2] : vector<1x4x16xf32> to vector<1xf32>
    %55 = vector.shape_cast %54 : vector<1xf32> to vector<1x1x1xf32>
    %56 = vector.extract %55[0, 0, 0] : f32 from vector<1x1x1xf32>
    %57 = vector.broadcast %56 : f32 to vector<1x1xf32>
    %cst_19 = arith.constant 1.562500e-02 : f32
    %58 = vector.broadcast %cst_19 : f32 to vector<1x1xf32>
    %59 = arith.mulf %51, %58 : vector<1x1xf32>
    %cst_20 = arith.constant 1.562500e-02 : f32
    %60 = vector.broadcast %cst_20 : f32 to vector<1x1xf32>
    %61 = arith.mulf %57, %60 : vector<1x1xf32>
    %62 = arith.mulf %59, %59 : vector<1x1xf32>
    %63 = arith.subf %61, %62 : vector<1x1xf32>
    %cst_21 = arith.constant 9.99999974E-6 : f32
    %64 = vector.broadcast %cst_21 : f32 to vector<1x1xf32>
    %65 = arith.addf %63, %64 : vector<1x1xf32>
    %66 = math.rsqrt %65 : vector<1x1xf32>
    %67 = vector.shape_cast %66 : vector<1x1xf32> to vector<1x1xf32>
    %68 = vector.broadcast %67 : vector<1x1xf32> to vector<4x1xf32>
    %69 = vector.shape_cast %59 : vector<1x1xf32> to vector<1x1xf32>
    %70 = vector.broadcast %69 : vector<1x1xf32> to vector<4x1xf32>
    %71 = tpu.concatenate %41, %68 in 0 : vector<4x1xf32>, vector<4x1xf32> -> vector<8x1xf32>
    %72 = tpu.concatenate %43, %70 in 0 : vector<4x1xf32>, vector<4x1xf32> -> vector<8x1xf32>
    %73 = arith.mulf %13, %71 : vector<8x1xf32>
    %74 = arith.subf %12, %72 : vector<8x1xf32>
    %75 = arith.mulf %74, %73 : vector<8x1xf32>
    %76 = arith.addf %75, %14 : vector<8x1xf32>
    %77 = vector.shape_cast %73 : vector<8x1xf32> to vector<8x1xf32>
    %78 = vector.broadcast %77 : vector<8x1xf32> to vector<8x16xf32>
    %79 = vector.shape_cast %76 : vector<8x1xf32> to vector<8x1xf32>
    %80 = vector.broadcast %79 : vector<8x1xf32> to vector<8x16xf32>
    %cst_22 = arith.constant 0.000000e+00 : f32
    %81 = vector.broadcast %cst_22 : f32 to vector<8x112xf32>
    %82 = tpu.concatenate %78, %81 in 1 : vector<8x16xf32>, vector<8x112xf32> -> vector<8x128xf32>
    %83 = tpu.concatenate %80, %81 in 1 : vector<8x16xf32>, vector<8x112xf32> -> vector<8x128xf32>
    %84 = arith.mulf %11, %82 : vector<8x128xf32>
    %85 = arith.addf %84, %83 : vector<8x128xf32>
    %cst_23 = arith.constant 0.000000e+00 : f32
    %86 = vector.broadcast %cst_23 : f32 to vector<8x128xf32>
    %87 = arith.maximumf %85, %86 : vector<8x128xf32>
    %c0_24 = arith.constant 0 : index
    %c0_25 = arith.constant 0 : index
    %88 = vector.load %arg6[%c0_24, %c0_25] : memref<8x128xf32, #tpu.memory_space<vmem>>, vector<8x128xf32>
    tpu.vector_store %arg6[%c0_24, %c0_25], %87 {strides = array<i32>} : memref<8x128xf32, #tpu.memory_space<vmem>>, vector<8x128xf32>,
    return
  }
  func.func @transform_0(%arg0: i32) -> (i32, i32, i32) {
    %c0_i32 = arith.constant 0 : i32
    %c0_i32_0 = arith.constant 0 : i32
    %c0_i32_1 = arith.constant 0 : i32
    return %arg0, %c0_i32, %c0_i32_0 : i32, i32, i32
  }
  func.func @transform_1(%arg0: i32) -> (i32, i32) {
    %c0_i32 = arith.constant 0 : i32
    %c0_i32_0 = arith.constant 0 : i32
    %c0_i32_1 = arith.constant 0 : i32
    return %c0_i32, %c0_i32_0 : i32, i32
  }
  func.func @transform_2(%arg0: i32) -> (i32, i32) {
    %c0_i32 = arith.constant 0 : i32
    %c0_i32_0 = arith.constant 0 : i32
    %c0_i32_1 = arith.constant 0 : i32
    return %c0_i32, %c0_i32_0 : i32, i32
  }
  func.func @transform_3(%arg0: i32) -> (i32, i32) {
    %c0_i32 = arith.constant 0 : i32
    %c0_i32_0 = arith.constant 0 : i32
    %c0_i32_1 = arith.constant 0 : i32
    return %c0_i32, %c0_i32_0 : i32, i32
  }
  func.func @transform_4(%arg0: i32) -> (i32, i32) {
    %c0_i32 = arith.constant 0 : i32
    %c0_i32_0 = arith.constant 0 : i32
    %c0_i32_1 = arith.constant 0 : i32
    return %c0_i32, %c0_i32_0 : i32, i32
  }
  func.func @transform_5(%arg0: i32) -> (i32, i32) {
    %c0_i32 = arith.constant 0 : i32
    %c0_i32_0 = arith.constant 0 : i32
    return %c0_i32, %arg0 : i32, i32
  }
}

</mosaic_0001>

<bundles_post_ra>
// kernel: tpu_custom_call.1
= control target key start
LH: loop header
LB: loop body
LE: loop exit
PB: predicated region body
PF: predicated region fallthrough
CT: control target
= control target key end

     0   :  { %10 = vsyncpa [#allocation3], 0  ;;  %s800_s0 = inlined_call_operand.vmem [shape: f32[2,4,16], index: 0, kind: input, shape index: {}]   ;;  %s801_s1 = inlined_call_operand.vmem [shape: f32[8,12], index: 1, kind: input, shape index: {}]   ;;  %s802_s2 = inlined_call_operand.vmem [shape: f32[8,1], index: 2, kind: input, shape index: {}]   ;;  %s803_s3 = inlined_call_operand.vmem [shape: f32[8,1], index: 3, kind: input, shape index: {}]   ;;  %s804_s4 = inlined_call_operand.vmem [shape: f32[8,1], index: 4, kind: input, shape index: {}]   ;;  %s805_s5 = inlined_call_operand.hbm [shape: f32[8,256], index: 5, kind: output, shape index: {}]  }
   0x1   :  { %12 = vsyncpa [#allocation3 + $0x1], 0  ;;  %s672_s18 = smov 0   ;;  %s674_s19 = smov 0  }
   0x2   :  { %s676_s20 = smov 0   ;;  %s678_s21 = smov 0  }
   0x3 LB: > { %s693_s22 = sadd.s32 4294967295, %s633_s21   ;;  %s485_s23 = sadd.s32 4294967294, %s633_s21   ;;  %s633_s21 = sphi %s678_s21, %s811_s21   ;;  %s629_s20 = sphi %s676_s20, %s810_s20   ;;  %s625_s19 = sphi %s674_s19, %s809_s19   ;;  %s621_s18 = sphi %s672_s18, %s808_s18  }
   0x4   : > { %s697_s24 = sadd.s32 1, %s633_s21   ;;  %s135_s25 = sadd.s32 1, %s629_s20 }
   0x5   : > { %s132_s26 = ssub.s32 %s633_s21, %s697_s24  ;;  %p145_p0 = scmp.ne.s32.totalorder %s629_s20, %s625_s19 }
   0x6   : > { %p133_p1 = scmp.eq.s32.totalorder %s132_s26, 0  ;;  %p146_p2 = scmp.eq.s32.totalorder %s693_s22, 1 }
   0x7   : > { %p151_p3 = scmp.ne.s32.totalorder %s625_s19, %s621_s18  ;;  %p152_p4 = scmp.eq.s32.totalorder %s485_s23, 1 }
   0x8   : > { %s708_s27 = scalar_select %p133_p1, %s629_s20, %s135_s25  }
   0x9   : > { %p710_p5 = por %p146_p2, %p145_p0  ;;  %p714_p6 = por %p152_p4, %p151_p3 }
   0xa   : > { %p488_p7 = scmp.ge.s32.totalorder %s633_s21, 1  ;;  %p189_p8 = scmp.lt.s32.totalorder %s633_s21, 3 }
   0xc   : > { %p190_p9 = pnand %p488_p7, %p189_p8 }
   0xd   : > { %p216_p10 = scmp.lt.s32.totalorder (!%p190_p9), %s693_s22, 1  ;;  %v635_v0 = vmov (!%p190_p9), 0.0|0.0   ;;  %vm636_vm0 = vmmov (!%p190_p9), 0   ;;  %v637_v1 = vmov (!%p190_p9), 0.0   ;;  %v728_v2 = vld [vmem:[%s802_s2] sm:$0xff] (!%p190_p9)  ;;  %v638_v4 = vmov (!%p190_p9), 0  }
   0xe   : > { %193 = sbr.rel (%p190_p9) target bundleno = 751 (0x2ef), region = 40  ;;  %508 = vmatprep.subr.bf16.mxu0 (!%p190_p9), %v635_v0  ;;  %505 = vmatprep.mubr.msk.f32.mxu0 (!%p190_p9), %vm636_vm0, %v637_v1  ;;  %s639_s12 = smov (!%p190_p9), 1   ;;  %vm225_vm1 = vcmask (!%p190_p9), 7168   ;;  %vm230_vm2 = vcmask (!%p190_p9), 121856   ;;  %vm234_vm3 = vcmask (!%p190_p9), 1043456   ;;  %vm236_vm4 = vcmask (!%p190_p9), 130048  }
   0xf   : > { %565 = vset.pattern.permute.xlu1 (!%p190_p9), %v638_v4  ;;  %566 = vset.pattern.permute.xlu0 (!%p190_p9), %v638_v4  ;;  %s640_s13 = smov (!%p190_p9), 127   ;;  %vm510_vm5 = vmpackc.low (!%p190_p9), %vm234_vm3, %vm236_vm4  ;;  %v239_v13 = vld [vmem:[%s801_s1] sm:$0xff] (!%p190_p9)  ;;  %vm240_vm6 = vcmask (!%p190_p9), 97280   ;;  %vm326_vm7 = vcmask (!%p190_p9), 125952   ;;  %s213_s8 = sand.u32 (!%p190_p9), 1, %s625_s19  }
  0x10   : > { %322 = vperm.xlu1 (!%p190_p9), %565, %v728_v2   ;;  %s495_s10 = sshll.u32 (!%p190_p9), %s693_s22, 7 }
  0x11   : > { %s758_s15 = scalar_lea.hbm (!%p190_p9), %s805_s5, %s495_s10 }
  0x15   : > { %s217_s30 = scalar_select %p216_p10, %s693_s22, 1 }
  0x16   : > { %s641_s22 = smov [#allocation2]  }
  0x17   : > { %s490_s6 = sshll.u32 %s217_s30, 2 }
  0x18   : > { %s219_s9 = scalar_lea.vmem %s800_s0, %s490_s6 }
  0x19   : > { %v220_v3 = vld [vmem:[%s219_s9] sm:$0xf]  ;;  %s489_s9 = sshll.u32 %s213_s8, 3 }
  0x1a   : > { %222 = vrot.lane.b32.xlu0 %v220_v3, %s639_s12  ;;  %v232_v6 = vrot.slane %v220_v3, 4  ;;  %s215_s11 = scalar_lea.vmem [#allocation2], %s489_s9 }
  0x1b   : > { %s426_s12 = sshll.u32 %s215_s11, 4  ;;  %s760_s12 = int_to_ptr.vmem [resolvable:$true] %s426_s12 }
  0x1e   : > { %227 = vrot.lane.b32.xlu0 %v220_v3, %s640_s13 }
  0x8c   : > { %v223_v5 = vpop.permute.xlu0 %222 }
  0x8d   : > { %v226_v7 = vsel %vm225_vm1, 0.0, %v223_v5 }
  0x8e   : > { %v235_v10 = vsel %vm234_vm3, %v226_v7, %v232_v6  ;;  %v318_v6 = vld [vmem:[%s803_s3] sm:$0xff] }
  0x8f   : > { %v323_v14 = vpop.permute.xlu1 %322 }
  0x90   : > { %v228_v8 = vpop.permute.xlu0 %227 }
  0x91   : > { %v231_v9 = vsel %vm230_vm2, %v228_v8, 0.0 }
  0x92   : > { %v238_v11 = vsel %vm236_vm4, %v231_v9, 0.0 }
  0x93   : > { %v509_v12 = vpack.c.bf16 %v238_v11, %v235_v10  ;;  %v319_v11 = vld [vmem:[%s804_s4] sm:$0xff] }
  0x95   : > { %511 = vmatpush3.bf16.msk.msra.mxu0 %vm510_vm5, %v509_v12 }
  0x98   : > { %506 = vmatmul.mubr.msk.f32.vlgmr.msra.gmra.mrb[0].mxu0 %vm240_vm6, %v239_v13 }
 0x16b   : > { %v738_v15 = vpop.f32.mrb[0].mxu0 }
 0x16c   : > { %v325_v16 = vadd.f32 %v323_v14, %v738_v15  ;;  %v507_v17 = vpop.f32.mrb[1].mxu0 }
 0x16e   : > { %v327_v18 = vsel %vm326_vm7, %v325_v16, 0.0  ;;  %v338_v19 = vmul.f32 %v325_v16, %v325_v16  ;;  %v357_v22 = vrot.slane %v325_v16, 4 }
 0x16f   : > { %328 = vadd.xlane.f32.xlu1 %v327_v18 }
 0x170   : > { %v339_v20 = vsel %vm326_vm7, %v338_v19, 0.0  ;;  %v371_v21 = vrot.slane %v338_v19, 4  ;;  %v359_v24 = vsel %vm326_vm7, %v357_v22, 0.0 }
 0x171   : > { %340 = vadd.xlane.f32.xlu0 %v339_v20 }
 0x172   : > { %v373_v23 = vsel %vm326_vm7, %v371_v21, 0.0 }
 0x173   : > { %374 = vadd.xlane.f32.xlu1 %v373_v23 }
 0x175   : > { %360 = vadd.xlane.f32.xlu0 %v359_v24 }
 0x1fc   : > { %v329_v25 = vpop.xlane.xlu1 %328 }
 0x1fd   : > { %v330_v26 = vrot.slane %v329_v25, 4 }
 0x1fe   : > { %v341_v27 = vpop.xlane.xlu0 %340 }
 0x1ff   : > { %v331_v28 = vadd.f32 %v330_v26, %v329_v25  ;;  %v342_v29 = vrot.slane %v341_v27, 4 }
 0x200   : > { %v375_v30 = vpop.xlane.xlu1 %374 }
 0x201   : > { %v332_v31 = vrot.slane %v331_v28, 2  ;;  %v343_v32 = vadd.f32 %v342_v29, %v341_v27  ;;  %v376_v33 = vrot.slane %v375_v30, 4 }
 0x202   : > { %v361_v34 = vpop.xlane.xlu0 %360 }
 0x203   : > { %v344_v35 = vrot.slane %v343_v32, 2  ;;  %v377_v36 = vadd.f32 %v376_v33, %v375_v30  ;;  %v362_v37 = vrot.slane %v361_v34, 4  ;;  %v333_v38 = vadd.f32 %v332_v31, %v331_v28 }
 0x205   : > { %v378_v39 = vrot.slane %v377_v36, 2  ;;  %v363_v40 = vadd.f32 %v362_v37, %v361_v34  ;;  %v334_v41 = vrot.slane %v333_v38, 1  ;;  %v345_v42 = vadd.f32 %v344_v35, %v343_v32 }
 0x207   : > { %v364_v43 = vrot.slane %v363_v40, 2  ;;  %v335_v44 = vadd.f32 %v334_v41, %v333_v38  ;;  %v346_v45 = vrot.slane %v345_v42, 1  ;;  %v379_v46 = vadd.f32 %v378_v39, %v377_v36 }
 0x209   : > { %512 = vpush %v335_v44  ;;  %v347_v47 = vadd.f32 %v346_v45, %v345_v42  ;;  %v365_v48 = vadd.f32 %v364_v43, %v363_v40  ;;  %v380_v49 = vrot.slane %v379_v46, 1 }
 0x20b   : > { %514 = vpush %v347_v47  ;;  %v366_v50 = vrot.slane %v365_v48, 1  ;;  %v381_v52 = vadd.f32 %v380_v49, %v379_v46 }
 0x20d   : > { %v367_v51 = vadd.f32 %v366_v50, %v365_v48 }
 0x20f   : > { %516 = vpush %v367_v51 }
 0x210   : > { %518 = vpush %v381_v52 }
 0x23a   : > { %s513_s16 = spop %512 }
 0x23b   : > { %v337_v53 = vstv %s513_s16  ;;  %s413_s16 = scalar_lea.sflag [#allocation3], %s213_s8 }
 0x23c   : > { %v350_v54 = vmul.f32 0.015625, %v337_v53  ;;  %s515_s17 = spop %514 }
 0x23d   : > { %v349_v55 = vstv %s515_s17  ;;  %s571_s17 = scalar_lea.vmem %s760_s12, 128 }
 0x23e   : > { %v352_v56 = vmul.f32 %v350_v54, %v350_v54  ;;  %v351_v57 = vmul.f32 0.015625, %v349_v55  ;;  %p572_p11 = scmp.ne.s32.totalorder %s760_s12, %s571_s17 }
 0x240   : > { %s517_s23 = spop %516  ;;  %v353_v58 = vsub.f32 %v351_v57, %v352_v56  ;;  %p573_p12 = pnand %p572_p11, %p710_p5 }
 0x241   : > { %v369_v59 = vstv %s517_s23  ;;  %s519_s25 = spop %518  ;;  %s575_s23 = sshll.u32 %s641_s22, 4  ;;  %s576_s23 = int_to_ptr.vmem [resolvable:$false] %s575_s23 }
 0x242   : > { %v384_v60 = vmul.f32 0.015625, %v369_v59  ;;  %v383_v61 = vstv %s519_s25  ;;  %v354_v0 = vadd.f32 1e-05, %v353_v58  ;;  %p574_p13 = pneg %p573_p12  ;;  %s577_s25 = scalar_lea.vmem %s576_s23, 256 }
 0x243   : > { %v385_v63 = vmul.f32 0.015625, %v383_v61  ;;  %p578_p0 = scmp.lt.s32.totalorder %s760_s12, %s576_s23  ;;  %p579_p1 = scmp.lt.s32.totalorder %s577_s25, %s571_s17 }
 0x244   : > { %v386_v62 = vmul.f32 %v384_v60, %v384_v60  ;;  %567 = vrsqrt.f32 %v354_v0  ;;  %v391_v5 = vsel %vm234_vm3, %v350_v54, %v384_v60 }
 0x245   : > { %v393_v9 = vsub.f32 %v728_v2, %v391_v5  ;;  %p580_p2 = por %p579_p1, %p578_p0 }
 0x246   : > { %v387_v1 = vsub.f32 %v385_v63, %v386_v62 }
 0x247   : > { %p581_p3 = pnand %p580_p2, %p574_p13 }
 0x248   : > { %v388_v3 = vadd.f32 1e-05, %v387_v1 }
 0x24a   : > { %569 = vrsqrt.f32 %v388_v3 }
 0x24e   : > { %v568_v4 = vpop.eup %567 }
 0x254   : > { %v570_v7 = vpop.eup %569 }
 0x255   : > { %v390_v8 = vsel %vm234_vm3, %v568_v4, %v570_v7 }
 0x256   : > { %v392_v10 = vmul.f32 %v390_v8, %v318_v6 }
 0x258   : > { %398 = vperm.xlu0 %566, %v392_v10   ;;  %v394_v12 = vmul.f32 %v393_v9, %v392_v10 }
 0x25a   : > { %v395_v13 = vadd.f32 %v394_v12, %v319_v11 }
 0x25c   : > { %403 = vperm.xlu1 %565, %v395_v13  }
 0x2d7   : > { %v399_v14 = vpop.permute.xlu0 %398 }
 0x2d8   : > { %v406_v16 = vsel %vm236_vm4, %v399_v14, 0.0 }
 0x2d9   : > { %v408_v17 = vmul.f32 %v406_v16, %v738_v15 }
 0x2db   : > { %v404_v18 = vpop.permute.xlu1 %403 }
 0x2dc   : > { %v407_v2 = vsel %vm236_vm4, %v404_v18, 0.0 }
 0x2dd   : > { %v409_v19 = vadd.f32 %v408_v17, %v407_v2 }
 0x2df   : > { %v410_v20 = vmax.f32 %v409_v19, 0.0 }
 0x2e1   : > { %411 = vst [vmem:[%s215_s11] sm:$0xff] %v410_v20 }
 0x2e2   : > { %584 = shalt.err (!%p581_p3)
}
 0x2e3   : > { %s585_s26 = scalar_lea.hbm %s758_s15, 128  ;;  %s589_s7 = scalar_lea.hbm %s805_s5, 256 }
 0x2e4   : > { %p586_p4 = scmp.ne.s32.totalorder %s758_s15, %s585_s26  ;;  %p590_p9 = scmp.lt.u32.totalorder %s758_s15, %s805_s5 }
 0x2e5   : > { %p591_p10 = scmp.lt.u32.totalorder %s589_s7, %s585_s26  ;;  %p593_p12 = scmp.lt.u32.totalorder %s585_s26, %s758_s15 }
 0x2e6   : > { %p587_p7 = pnand %p586_p4, %p710_p5 }
 0x2e7   : > { %p592_p11 = por %p591_p10, %p590_p9 }
 0x2e8   : > { %p588_p8 = pneg %p587_p7 }
 0x2e9   : > { %p594_p13 = por %p593_p12, %p592_p11 }
 0x2eb   : > { %p595_p0 = pnand %p594_p13, %p588_p8 }
 0x2ed   : > { %598 = shalt.err (!%p595_p0)
}
 0x2ee   : > { %520 = dma.vmem_to_hbm [thread:$0]  (%p710_p5), %s760_s12, 128, %s758_s15, %s413_s16  }
 0x2ef PF: > { %p526_p1 = scmp.ge.s32.totalorder %s633_s21, 2  ;;  %s438_s10 = sand.u32 1, %s621_s18  }
 0x2f0   : > { %s439_s11 = scalar_lea.sflag [#allocation3], %s438_s10 }
 0x2f1   : > { %p523_p2 = pnand %p526_p1, %p714_p6 }
 0x2f3   : > { %616 = dma.done.wait (!%p523_p2), %s439_s11, 128  }
 0x2f4   : > { %618 = vsyncadd (!%p523_p2), %s439_s11, 4294967168  ;;  %p15_p3 = scmp.ge.s32.totalorder %s697_s24, 4   ;;  %s808_s18 = smov %s625_s19 }
 0x2f5   : > { %s809_s19 = smov %s629_s20  ;;  %s810_s20 = smov %s708_s27 }
 0x2f6   : > { %s811_s21 = smov %s697_s24  ;;  %17 = sbr.rel (!%p15_p3) target bundleno = 3 (0x3), region = 75 }
 0x2fd   :  { %444 = vsyncpa [#allocation3], 1 }
 0x2fe   :  { %446 = vsyncpa [#allocation3 + $0x1], 1 }

</bundles_post_ra>
